<compile_context>
chip_gen: v7x
topology: tpu7x:2x2x1
jax: 0.10.0
libtpu: 0.0.40
codegen_flags: <defaults>
</compile_context>

<pallas_src>
import jax
import jax.numpy as jnp
from jax.experimental import pallas as pl
from jax.experimental.pallas import tpu as pltpu


HIDDEN1 = 400   # logical (PyTorch) hidden sizes
HIDDEN2 = 300


def _round_up(x, m):
    return ((x + m - 1) // m) * m


def critic_d4pg_kernel(x_ref, a_ref,
                       w1_ref, b1_ref,
                       w2o_ref, w2a_ref, b2_ref,
                       w3_ref, b3_ref,
                       out_ref):
    # obs_net: Linear(obs_p, 512) + ReLU  (padding cols of w1/b1 are zero)
    obs = jnp.dot(x_ref[...], w1_ref[...], preferred_element_type=jnp.float32)
    obs = jnp.maximum(obs + b1_ref[...], 0.0).astype(jnp.bfloat16)

    # qdist_net layer 1:  concat([obs, a]) @ W2  realized as two MXU matmuls
    # (obs part K=512, action part K=128) summed in the f32 accumulator.
    h = jnp.dot(obs, w2o_ref[...], preferred_element_type=jnp.float32)
    h = h + jnp.dot(a_ref[...], w2a_ref[...], preferred_element_type=jnp.float32)
    h = jnp.maximum(h + b2_ref[...], 0.0).astype(jnp.bfloat16)

    # qdist_net layer 2: [TM,384] x [384,128] + bias (lane-dense output)
    q = jnp.dot(h, w3_ref[...], preferred_element_type=jnp.float32)
    out_ref[...] = (q + b3_ref[...]).astype(out_ref.dtype)


def critic_d4pg_forward(x, a, padded_params, n_atoms, *,
                        tm_max=512, out_dtype=jnp.float32):
    """x: [B, obs_size] f32, a: [B, act_size] f32 -> [B, n_atoms] out_dtype."""
    w1p, b1p, w2op, w2ap, b2p, w3p, b3p = padded_params
    B, obs_size = x.shape
    act_size = a.shape[1]
    OBS_P, H1P = w1p.shape
    ACT_P = w2ap.shape[0]
    H2P = w2op.shape[1]
    NOUT = w3p.shape[1]

    # Tight batch tiling: pick the number of tiles first, then a TM (multiple
    # of 8 sublanes) that covers B with minimal padding.  B > tm_max gives
    # >= 2 grid steps so v7x can shard the parallel axis over both TCs.
    num_tiles = max(-(-B // tm_max), 1)
    TM = _round_up(-(-B // num_tiles), 8)
    Bp = TM * num_tiles
    grid = (num_tiles,)

    # Narrow, lane-aligned bf16 input tiles (padding rows/lanes are zero).
    xp = jnp.zeros((Bp, OBS_P), jnp.bfloat16).at[:B, :obs_size].set(
        x.astype(jnp.bfloat16))
    ap = jnp.zeros((Bp, ACT_P), jnp.bfloat16).at[:B, :act_size].set(
        a.astype(jnp.bfloat16))

    # Weights / biases stay VMEM-resident across all batch-grid iterations.
    def resident(arr):
        return pl.BlockSpec(arr.shape, lambda i: (0, 0))

    flops = 2 * Bp * (OBS_P * H1P + H1P * H2P + ACT_P * H2P + H2P * NOUT)
    weight_bytes = (w1p.size + w2op.size + w2ap.size + w3p.size) * 2
    bias_bytes = (b1p.size + b2p.size + b3p.size) * 4
    io_bytes = (xp.size + ap.size) * 2 + Bp * NOUT * jnp.dtype(out_dtype).itemsize
    bytes_accessed = weight_bytes + bias_bytes + io_bytes

    out = pl.pallas_call(
        critic_d4pg_kernel,
        out_shape=jax.ShapeDtypeStruct((Bp, NOUT), out_dtype),
        grid=grid,
        in_specs=[
            pl.BlockSpec((TM, OBS_P), lambda i: (i, 0)),  # obs batch tile
            pl.BlockSpec((TM, ACT_P), lambda i: (i, 0)),  # action batch tile
            resident(w1p), resident(b1p),
            resident(w2op), resident(w2ap), resident(b2p),
            resident(w3p), resident(b3p),
        ],
        out_specs=pl.BlockSpec((TM, NOUT), lambda i: (i, 0)),
        compiler_params=pltpu.CompilerParams(
            dimension_semantics=("parallel",)),
        cost_estimate=pl.CostEstimate(
            flops=flops, transcendentals=0, bytes_accessed=bytes_accessed),
    )(xp, ap, w1p, b1p, w2op, w2ap, b2p, w3p, b3p)

    return out[:B, :n_atoms]


def make_params(key, obs_size, act_size, n_atoms):
    """PyTorch-Linear-like uniform init, stored as [in, out] / [1, out]."""
    ks = jax.random.split(key, 6)

    def lin(kw, kb, fan_in, fan_out):
        bound = 1.0 / (fan_in ** 0.5)
        w = jax.random.uniform(kw, (fan_in, fan_out), jnp.float32, -bound, bound)
        b = jax.random.uniform(kb, (1, fan_out), jnp.float32, -bound, bound)
        return w, b

    w1, b1 = lin(ks[0], ks[1], obs_size, HIDDEN1)
    w2, b2 = lin(ks[2], ks[3], HIDDEN1 + act_size, HIDDEN2)
    w3, b3 = lin(ks[4], ks[5], HIDDEN2, n_atoms)
    return (w1, b1, w2, b2, w3, b3)


def pad_params(params, obs_size, act_size, n_atoms):
    """Zero-pad to lane-aligned shapes; split W2 into obs/action row blocks.
    Weights cast to bf16, biases stay f32."""
    w1, b1, w2, b2, w3, b3 = params
    OBS_P = _round_up(max(obs_size, 8), 128)   # 128
    H1P = _round_up(HIDDEN1, 128)              # 512
    ACT_P = _round_up(max(act_size, 8), 128)   # 128
    H2P = _round_up(HIDDEN2, 128)              # 384
    NOUT = _round_up(n_atoms, 128)             # 128

    w1p = jnp.zeros((OBS_P, H1P), jnp.float32).at[:obs_size, :HIDDEN1].set(w1)
    b1p = jnp.zeros((1, H1P), jnp.float32).at[:, :HIDDEN1].set(b1)
    # W2 rows 0:400 act on obs features; rows 400:400+act act on raw actions.
    w2op = jnp.zeros((H1P, H2P), jnp.float32).at[:HIDDEN1, :HIDDEN2].set(
        w2[:HIDDEN1])
    w2ap = jnp.zeros((ACT_P, H2P), jnp.float32).at[:act_size, :HIDDEN2].set(
        w2[HIDDEN1:HIDDEN1 + act_size])
    b2p = jnp.zeros((1, H2P), jnp.float32).at[:, :HIDDEN2].set(b2)
    w3p = jnp.zeros((H2P, NOUT), jnp.float32).at[:HIDDEN2, :n_atoms].set(w3)
    b3p = jnp.zeros((1, NOUT), jnp.float32).at[:, :n_atoms].set(b3)

    return (w1p.astype(jnp.bfloat16), b1p,
            w2op.astype(jnp.bfloat16), w2ap.astype(jnp.bfloat16), b2p,
            w3p.astype(jnp.bfloat16), b3p)


def reference_forward(x, a, params):
    """Pure-JAX reference of the PyTorch forward, using the bf16-rounded
    weights the kernel actually consumes (activations kept in f32)."""
    w1, b1, w2, b2, w3, b3 = params
    f = lambda w: w.astype(jnp.bfloat16).astype(jnp.float32)
    obs = jnp.maximum(x @ f(w1) + b1, 0.0)
    qin = jnp.concatenate([obs, a], axis=1)
    h = jnp.maximum(qin @ f(w2) + b2, 0.0)
    return h @ f(w3) + b3


if __name__ == "__main__":
    B = 8
    obs_size = 16
    act_size = 8
    n_atoms = 51
    v_min, v_max = -10.0, 10.0  # supports buffer only used by dist2qval, not forward
    # TODO(synk): dist2qval (softmax + expectation over supports) is not part
    # of forward() and is left to plain JAX downstream.

    key = jax.random.PRNGKey(0)
    kx, ka, kp = jax.random.split(key, 3)
    x = jax.random.normal(kx, (B, obs_size), jnp.float32)
    a = jax.random.normal(ka, (B, act_size), jnp.float32)

    params = make_params(kp, obs_size, act_size, n_atoms)
    padded = pad_params(params, obs_size, act_size, n_atoms)

    out = critic_d4pg_forward(x, a, padded, n_atoms)
    out = jax.block_until_ready(out)

    ref = reference_forward(x, a, params)
    assert out.shape == (B, n_atoms)
    # Kernel rounds activations (incl. raw actions) to bf16 before each MXU
    # matmul (f32 accum); tolerance sized for that accepted precision tradeoff.
    assert jnp.allclose(out, ref, atol=2e-2, rtol=2e-2), (
        float(jnp.max(jnp.abs(out - ref))))

    print("KERNEL_OK")
</pallas_src>

<mosaic_0001>
module attributes {stable_mosaic.version = 11 : i64} {
  func.func @critic_d4pg_kernel(%arg0: i32, %arg1: memref<8x128xbf16, #tpu.memory_space<vmem>>, %arg2: memref<8x128xbf16, #tpu.memory_space<vmem>>, %arg3: memref<128x512xbf16, #tpu.memory_space<vmem>>, %arg4: memref<1x512xf32, #tpu.memory_space<vmem>>, %arg5: memref<512x384xbf16, #tpu.memory_space<vmem>>, %arg6: memref<128x384xbf16, #tpu.memory_space<vmem>>, %arg7: memref<1x384xf32, #tpu.memory_space<vmem>>, %arg8: memref<384x128xbf16, #tpu.memory_space<vmem>>, %arg9: memref<1x128xf32, #tpu.memory_space<vmem>>, %arg10: memref<8x128xf32, #tpu.memory_space<vmem>>) attributes {dimension_semantics = [#tpu.dimension_semantics<parallel>], iteration_bounds = array<i64: 1>, scalar_prefetch = 0 : i64, scratch_operands = 0 : i64, tpu.core_type = #tpu.core_type<tc>, window_params = [{transform_indices = @transform_0, window_bounds = array<i64: 8, 128>}, {transform_indices = @transform_1, window_bounds = array<i64: 8, 128>}, {pipeline_mode = #tpu.pipeline_mode<synchronous>, transform_indices = @transform_2, window_bounds = array<i64: 128, 512>}, {pipeline_mode = #tpu.pipeline_mode<synchronous>, transform_indices = @transform_3, window_bounds = array<i64: 1, 512>}, {pipeline_mode = #tpu.pipeline_mode<synchronous>, transform_indices = @transform_4, window_bounds = array<i64: 512, 384>}, {pipeline_mode = #tpu.pipeline_mode<synchronous>, transform_indices = @transform_5, window_bounds = array<i64: 128, 384>}, {pipeline_mode = #tpu.pipeline_mode<synchronous>, transform_indices = @transform_6, window_bounds = array<i64: 1, 384>}, {pipeline_mode = #tpu.pipeline_mode<synchronous>, transform_indices = @transform_7, window_bounds = array<i64: 384, 128>}, {pipeline_mode = #tpu.pipeline_mode<synchronous>, transform_indices = @transform_8, window_bounds = array<i64: 1, 128>}, {transform_indices = @transform_9, window_bounds = array<i64: 8, 128>}]} {
    %c0 = arith.constant 0 : index
    %c0_0 = arith.constant 0 : index
    %0 = vector.load %arg1[%c0, %c0_0] : memref<8x128xbf16, #tpu.memory_space<vmem>>, vector<8x128xbf16>
    %c0_1 = arith.constant 0 : index
    %c0_2 = arith.constant 0 : index
    %1 = vector.load %arg3[%c0_1, %c0_2] : memref<128x512xbf16, #tpu.memory_space<vmem>>, vector<128x512xbf16>
    %cst = arith.constant dense<0.000000e+00> : vector<8x512xf32>
    %2 = tpu.matmul %0, %1, %cst {dimension_numbers = #tpu.dot_dimension_numbers<[1], [0], [0], [1], [0, 0, 1, 1], [], []>} : vector<8x128xbf16>, vector<128x512xbf16>, vector<8x512xf32> -> vector<8x512xf32>
    %c0_3 = arith.constant 0 : index
    %c0_4 = arith.constant 0 : index
    %3 = vector.load %arg4[%c0_3, %c0_4] : memref<1x512xf32, #tpu.memory_space<vmem>>, vector<1x512xf32>
    %4 = vector.broadcast %3 : vector<1x512xf32> to vector<8x512xf32>
    %5 = arith.addf %2, %4 : vector<8x512xf32>
    %cst_5 = arith.constant 0.000000e+00 : f32
    %6 = vector.broadcast %cst_5 : f32 to vector<8x512xf32>
    %7 = arith.maximumf %5, %6 : vector<8x512xf32>
    %8 = arith.truncf %7 : vector<8x512xf32> to vector<8x512xbf16>
    %c0_6 = arith.constant 0 : index
    %c0_7 = arith.constant 0 : index
    %9 = vector.load %arg5[%c0_6, %c0_7] : memref<512x384xbf16, #tpu.memory_space<vmem>>, vector<512x384xbf16>
    %cst_8 = arith.constant dense<0.000000e+00> : vector<8x384xf32>
    %10 = tpu.matmul %8, %9, %cst_8 {dimension_numbers = #tpu.dot_dimension_numbers<[1], [0], [0], [1], [0, 0, 1, 1], [], []>} : vector<8x512xbf16>, vector<512x384xbf16>, vector<8x384xf32> -> vector<8x384xf32>
    %c0_9 = arith.constant 0 : index
    %c0_10 = arith.constant 0 : index
    %11 = vector.load %arg2[%c0_9, %c0_10] : memref<8x128xbf16, #tpu.memory_space<vmem>>, vector<8x128xbf16>
    %c0_11 = arith.constant 0 : index
    %c0_12 = arith.constant 0 : index
    %12 = vector.load %arg6[%c0_11, %c0_12] : memref<128x384xbf16, #tpu.memory_space<vmem>>, vector<128x384xbf16>
    %cst_13 = arith.constant dense<0.000000e+00> : vector<8x384xf32>
    %13 = tpu.matmul %11, %12, %cst_13 {dimension_numbers = #tpu.dot_dimension_numbers<[1], [0], [0], [1], [0, 0, 1, 1], [], []>} : vector<8x128xbf16>, vector<128x384xbf16>, vector<8x384xf32> -> vector<8x384xf32>
    %14 = arith.addf %10, %13 : vector<8x384xf32>
    %c0_14 = arith.constant 0 : index
    %c0_15 = arith.constant 0 : index
    %15 = vector.load %arg7[%c0_14, %c0_15] : memref<1x384xf32, #tpu.memory_space<vmem>>, vector<1x384xf32>
    %16 = vector.broadcast %15 : vector<1x384xf32> to vector<8x384xf32>
    %17 = arith.addf %14, %16 : vector<8x384xf32>
    %cst_16 = arith.constant 0.000000e+00 : f32
    %18 = vector.broadcast %cst_16 : f32 to vector<8x384xf32>
    %19 = arith.maximumf %17, %18 : vector<8x384xf32>
    %20 = arith.truncf %19 : vector<8x384xf32> to vector<8x384xbf16>
    %c0_17 = arith.constant 0 : index
    %c0_18 = arith.constant 0 : index
    %21 = vector.load %arg8[%c0_17, %c0_18] : memref<384x128xbf16, #tpu.memory_space<vmem>>, vector<384x128xbf16>
    %cst_19 = arith.constant dense<0.000000e+00> : vector<8x128xf32>
    %22 = tpu.matmul %20, %21, %cst_19 {dimension_numbers = #tpu.dot_dimension_numbers<[1], [0], [0], [1], [0, 0, 1, 1], [], []>} : vector<8x384xbf16>, vector<384x128xbf16>, vector<8x128xf32> -> vector<8x128xf32>
    %c0_20 = arith.constant 0 : index
    %c0_21 = arith.constant 0 : index
    %23 = vector.load %arg9[%c0_20, %c0_21] : memref<1x128xf32, #tpu.memory_space<vmem>>, vector<1x128xf32>
    %24 = vector.broadcast %23 : vector<1x128xf32> to vector<8x128xf32>
    %25 = arith.addf %22, %24 : vector<8x128xf32>
    %c0_22 = arith.constant 0 : index
    %c0_23 = arith.constant 0 : index
    %26 = vector.load %arg10[%c0_22, %c0_23] : memref<8x128xf32, #tpu.memory_space<vmem>>, vector<8x128xf32>
    tpu.vector_store %arg10[%c0_22, %c0_23], %25 {strides = array<i32>} : memref<8x128xf32, #tpu.memory_space<vmem>>, vector<8x128xf32>,
    return
  }
  func.func @transform_0(%arg0: i32) -> (i32, i32) {
    %c0_i32 = arith.constant 0 : i32
    %c0_i32_0 = arith.constant 0 : i32
    return %arg0, %c0_i32 : i32, i32
  }
  func.func @transform_1(%arg0: i32) -> (i32, i32) {
    %c0_i32 = arith.constant 0 : i32
    %c0_i32_0 = arith.constant 0 : i32
    return %arg0, %c0_i32 : i32, i32
  }
  func.func @transform_2(%arg0: i32) -> (i32, i32) {
    %c0_i32 = arith.constant 0 : i32
    %c0_i32_0 = arith.constant 0 : i32
    %c0_i32_1 = arith.constant 0 : i32
    return %c0_i32, %c0_i32_0 : i32, i32
  }
  func.func @transform_3(%arg0: i32) -> (i32, i32) {
    %c0_i32 = arith.constant 0 : i32
    %c0_i32_0 = arith.constant 0 : i32
    %c0_i32_1 = arith.constant 0 : i32
    return %c0_i32, %c0_i32_0 : i32, i32
  }
  func.func @transform_4(%arg0: i32) -> (i32, i32) {
    %c0_i32 = arith.constant 0 : i32
    %c0_i32_0 = arith.constant 0 : i32
    %c0_i32_1 = arith.constant 0 : i32
    return %c0_i32, %c0_i32_0 : i32, i32
  }
  func.func @transform_5(%arg0: i32) -> (i32, i32) {
    %c0_i32 = arith.constant 0 : i32
    %c0_i32_0 = arith.constant 0 : i32
    %c0_i32_1 = arith.constant 0 : i32
    return %c0_i32, %c0_i32_0 : i32, i32
  }
  func.func @transform_6(%arg0: i32) -> (i32, i32) {
    %c0_i32 = arith.constant 0 : i32
    %c0_i32_0 = arith.constant 0 : i32
    %c0_i32_1 = arith.constant 0 : i32
    return %c0_i32, %c0_i32_0 : i32, i32
  }
  func.func @transform_7(%arg0: i32) -> (i32, i32) {
    %c0_i32 = arith.constant 0 : i32
    %c0_i32_0 = arith.constant 0 : i32
    %c0_i32_1 = arith.constant 0 : i32
    return %c0_i32, %c0_i32_0 : i32, i32
  }
  func.func @transform_8(%arg0: i32) -> (i32, i32) {
    %c0_i32 = arith.constant 0 : i32
    %c0_i32_0 = arith.constant 0 : i32
    %c0_i32_1 = arith.constant 0 : i32
    return %c0_i32, %c0_i32_0 : i32, i32
  }
  func.func @transform_9(%arg0: i32) -> (i32, i32) {
    %c0_i32 = arith.constant 0 : i32
    %c0_i32_0 = arith.constant 0 : i32
    return %arg0, %c0_i32 : i32, i32
  }
}

</mosaic_0001>

<bundles_post_ra>
// kernel: tpu_custom_call.1
= control target key start
LH: loop header
LB: loop body
LE: loop exit
PB: predicated region body
PF: predicated region fallthrough
CT: control target
= control target key end

     0   :  { %14 = vsyncpa [#allocation3], 0  ;;  %s2742_s0 = inlined_call_operand.hbm [shape: bf16[8,128], index: 0, kind: input, shape index: {}]   ;;  %s2743_s1 = inlined_call_operand.hbm [shape: bf16[8,128], index: 1, kind: input, shape index: {}]   ;;  %s2744_s2 = inlined_call_operand.hbm [shape: bf16[128,512], index: 2, kind: input, shape index: {}]   ;;  %s2745_s3 = inlined_call_operand.vmem [shape: f32[1,512], index: 3, kind: input, shape index: {}]   ;;  %s2746_s4 = inlined_call_operand.hbm [shape: bf16[512,384], index: 4, kind: input, shape index: {}]   ;;  %s2747_s5 = inlined_call_operand.hbm [shape: bf16[128,384], index: 5, kind: input, shape index: {}]   ;;  %s2748_s6 = inlined_call_operand.vmem [shape: f32[1,384], index: 6, kind: input, shape index: {}]   ;;  %s2749_s7 = inlined_call_operand.hbm [shape: bf16[384,128], index: 7, kind: input, shape index: {}]   ;;  %s2750_s8 = inlined_call_operand.vmem [shape: f32[1,128], index: 8, kind: input, shape index: {}]   ;;  %s2751_s9 = inlined_call_operand.hbm [shape: f32[8,128], index: 9, kind: output, shape index: {}]  }
   0x1   :  { %15 = vsyncpa [#allocation6], 0 }
   0x2   :  { %16 = vsyncpa [#allocation9], 0 }
   0x3   :  { %17 = vsyncpa [#allocation12], 0 }
   0x4   :  { %18 = vsyncpa [#allocation4], 0  ;;  %s2498_s30 = smov [#allocation5]   ;;  %s2499_s11 = smov [#allocation8]  }
   0x5   :  { %s35_s10 = sshll.u32 %s2498_s30, 4  ;;  %s58_s12 = sshll.u32 %s2499_s11, 4  ;;  %s36_s10 = int_to_ptr.vmem [resolvable:$true] %s35_s10  ;;  %s2564_s12 = int_to_ptr.vmem [resolvable:$true] %s58_s12 }
   0x6   :  { %s2334_s15 = scalar_lea.hbm %s2743_s1, 64 }
   0x7   :  { %p2335_p0 = scmp.ne.s32.totalorder %s2743_s1, %s2334_s15  ;;  %p2338_p1 = scmp.lt.u32.totalorder %s2334_s15, %s2743_s1 }
   0x9   :  { %p2340_p2 = pnand %p2338_p1, %p2335_p0 }
   0xb   :  { %2343 = shalt.err (!%p2340_p2)
}
   0xc   :  { %s2344_s20 = scalar_lea.vmem %s36_s10, 64  ;;  %p2349_p4 = scmp.lt.s32.totalorder %s36_s10, %s36_s10 }
   0xd   :  { %p2345_p3 = scmp.ne.s32.totalorder %s36_s10, %s2344_s20  ;;  %p2350_p5 = scmp.lt.s32.totalorder %s2344_s20, %s2344_s20 }
   0xf   :  { %p2351_p6 = por %p2350_p5, %p2349_p4 }
  0x11   :  { %p2352_p7 = pnand %p2351_p6, %p2345_p3 }
  0x13   :  { %2355 = shalt.err (!%p2352_p7)
}
  0x14   :  { %38 = dma.hbm_to_vmem [thread:$0]  %s2743_s1, 64, %s36_s10, [#allocation6]  }
  0x15   :  { %s2356_s25 = scalar_lea.hbm %s2746_s4, 12288 }
  0x16   :  { %p2357_p8 = scmp.ne.s32.totalorder %s2746_s4, %s2356_s25  ;;  %p2360_p9 = scmp.lt.u32.totalorder %s2356_s25, %s2746_s4 }
  0x18   :  { %p2362_p10 = pnand %p2360_p9, %p2357_p8 }
  0x1a   :  { %2365 = shalt.err (!%p2362_p10)
}
  0x1b   :  { %s2366_s30 = scalar_lea.vmem %s2564_s12, 12288  ;;  %p2371_p12 = scmp.lt.s32.totalorder %s2564_s12, %s2564_s12 }
  0x1c   :  { %p2367_p11 = scmp.ne.s32.totalorder %s2564_s12, %s2366_s30  ;;  %p2372_p13 = scmp.lt.s32.totalorder %s2366_s30, %s2366_s30 }
  0x1e   :  { %p2373_p0 = por %p2372_p13, %p2371_p12 }
  0x20   :  { %p2374_p1 = pnand %p2373_p0, %p2367_p11 }
  0x22   :  { %2377 = shalt.err (!%p2374_p1)
}
  0x23   :  { %s2500_s1 = smov 192   ;;  %s2501_s10 = smov 12  }
  0x24   :  { %64 = dma.hbm_to_vmem [thread:$0]  %s2746_s4, 12288, %s2564_s12, [#allocation9], %s2500_s1, %s2500_s1, %s2501_s10  }
  0x25   :  { %s2502_s14 = smov [#allocation2]   ;;  %s2503_s16 = smov [#allocation7]  }
  0x26   :  { %s25_s15 = sshll.u32 %s2502_s14, 4  ;;  %s44_s17 = sshll.u32 %s2503_s16, 4  ;;  %s26_s15 = int_to_ptr.vmem [resolvable:$true] %s25_s15  ;;  %s2598_s17 = int_to_ptr.vmem [resolvable:$true] %s44_s17 }
  0x27   :  { %s2378_s20 = scalar_lea.hbm %s2742_s0, 64 }
  0x28   :  { %p2379_p2 = scmp.ne.s32.totalorder %s2742_s0, %s2378_s20  ;;  %p2382_p3 = scmp.lt.u32.totalorder %s2378_s20, %s2742_s0 }
  0x2a   :  { %p2384_p4 = pnand %p2382_p3, %p2379_p2 }
  0x2c   :  { %2387 = shalt.err (!%p2384_p4)
}
  0x2d   :  { %s2388_s4 = scalar_lea.vmem %s26_s15, 64  ;;  %p2393_p6 = scmp.lt.s32.totalorder %s26_s15, %s26_s15 }
  0x2e   :  { %p2389_p5 = scmp.ne.s32.totalorder %s26_s15, %s2388_s4  ;;  %p2394_p7 = scmp.lt.s32.totalorder %s2388_s4, %s2388_s4 }
  0x30   :  { %p2395_p8 = por %p2394_p7, %p2393_p6 }
  0x32   :  { %p2396_p9 = pnand %p2395_p8, %p2389_p5 }
  0x34   :  { %2399 = shalt.err (!%p2396_p9)
}
  0x35   :  { %28 = dma.hbm_to_vmem [thread:$0]  %s2742_s0, 64, %s26_s15, [#allocation3]  }
  0x36   :  { %s2400_s28 = scalar_lea.hbm %s2744_s2, 4096 }
  0x37   :  { %p2401_p10 = scmp.ne.s32.totalorder %s2744_s2, %s2400_s28  ;;  %p2404_p11 = scmp.lt.u32.totalorder %s2400_s28, %s2744_s2 }
  0x39   :  { %p2406_p12 = pnand %p2404_p11, %p2401_p10 }
  0x3b   :  { %2409 = shalt.err (!%p2406_p12)
}
  0x3c   :  { %s2410_s14 = scalar_lea.vmem %s2598_s17, 4096  ;;  %p2415_p0 = scmp.lt.s32.totalorder %s2598_s17, %s2598_s17 }
  0x3d   :  { %p2411_p13 = scmp.ne.s32.totalorder %s2598_s17, %s2410_s14  ;;  %p2416_p1 = scmp.lt.s32.totalorder %s2410_s14, %s2410_s14 }
  0x3f   :  { %p2417_p2 = por %p2416_p1, %p2415_p0 }
  0x41   :  { %p2418_p3 = pnand %p2417_p2, %p2411_p13 }
  0x43   :  { %2421 = shalt.err (!%p2418_p3)
}
  0x44   :  { %s2504_s0 = smov 256   ;;  %s2505_s15 = smov 16  }
  0x45   :  { %50 = dma.hbm_to_vmem [thread:$0]  %s2744_s2, 4096, %s2598_s17, [#allocation6], %s2504_s0, %s2504_s0, %s2505_s15  }
  0x46   :  { %s2506_s19 = smov [#allocation10]   ;;  %s2507_s21 = smov [#allocation11]  }
  0x47   :  { %s70_s20 = sshll.u32 %s2506_s19, 4  ;;  %s84_s22 = sshll.u32 %s2507_s21, 4  ;;  %s71_s20 = int_to_ptr.vmem [resolvable:$true] %s70_s20  ;;  %s2629_s22 = int_to_ptr.vmem [resolvable:$true] %s84_s22 }
  0x48   :  { %s2422_s4 = scalar_lea.hbm %s2747_s5, 3072 }
  0x49   :  { %p2423_p4 = scmp.ne.s32.totalorder %s2747_s5, %s2422_s4  ;;  %p2426_p5 = scmp.lt.u32.totalorder %s2422_s4, %s2747_s5 }
  0x4b   :  { %p2428_p6 = pnand %p2426_p5, %p2423_p4 }
  0x4d   :  { %2431 = shalt.err (!%p2428_p6)
}
  0x4e   :  { %s2432_s2 = scalar_lea.vmem %s71_s20, 3072  ;;  %p2437_p8 = scmp.lt.s32.totalorder %s71_s20, %s71_s20 }
  0x4f   :  { %p2433_p7 = scmp.ne.s32.totalorder %s71_s20, %s2432_s2  ;;  %p2438_p9 = scmp.lt.s32.totalorder %s2432_s2, %s2432_s2 }
  0x51   :  { %p2439_p10 = por %p2438_p9, %p2437_p8 }
  0x53   :  { %p2440_p11 = pnand %p2439_p10, %p2433_p7 }
  0x55   :  { %2443 = shalt.err (!%p2440_p11)
}
  0x56   :  { %76 = dma.hbm_to_vmem [thread:$0]  %s2747_s5, 3072, %s71_s20, [#allocation9], %s2500_s1, %s2500_s1, %s2501_s10  }
  0x57   :  { %s2444_s11 = scalar_lea.hbm %s2749_s7, 3072 }
  0x58   :  { %p2445_p12 = scmp.ne.s32.totalorder %s2749_s7, %s2444_s11  ;;  %p2448_p13 = scmp.lt.u32.totalorder %s2444_s11, %s2749_s7 }
  0x5a   :  { %p2450_p0 = pnand %p2448_p13, %p2445_p12 }
  0x5c   :  { %2453 = shalt.err (!%p2450_p0)
}
  0x5d   :  { %s2454_s16 = scalar_lea.vmem %s2629_s22, 3072  ;;  %p2459_p2 = scmp.lt.s32.totalorder %s2629_s22, %s2629_s22 }
  0x5e   :  { %p2455_p1 = scmp.ne.s32.totalorder %s2629_s22, %s2454_s16  ;;  %p2460_p3 = scmp.lt.s32.totalorder %s2454_s16, %s2454_s16 }
  0x60   :  { %p2461_p4 = por %p2460_p3, %p2459_p2 }
  0x62   :  { %p2462_p5 = pnand %p2461_p4, %p2455_p1 }
  0x64   :  { %2465 = shalt.err (!%p2462_p5)
}
  0x65   :  { %s2508_s5 = smov 64   ;;  %s2509_s1 = smov 4  }
  0x66   :  { %90 = dma.hbm_to_vmem [thread:$0]  %s2749_s7, 3072, %s2629_s22, [#allocation12], %s2508_s5, %s2508_s5, %s2509_s1  }
  0x67   :  { %2488 = dma.done.wait [#allocation3], 64  }
  0x68   :  { %2489 = vsyncadd [#allocation3], 4294967232 }
  0x69   :  { %2490 = dma.done.wait [#allocation6], 4160  }
  0x6a   :  { %2491 = vsyncadd [#allocation6], 4294963136 }
  0x6b   :  { %2492 = dma.done.wait [#allocation9], 15360  }
  0x6c   :  { %2493 = vsyncadd [#allocation9], 4294951936 }
  0x6d   :  { %2494 = dma.done.wait [#allocation12], 3072  }
  0x6e   :  { %2495 = vsyncadd [#allocation12], 4294964224  ;;  %v2510_v0 = vmov 0   ;;  %v2102_v1 = vld [vmem:[#allocation7 + $0x4] ss:$16 sps:$4 sm:$0xff]   ;;  %v2511_v37 = vmov 0.0  }
  0x6f   :  { %359 = vmatprep.mubr.bf16.mxu0 %v2510_v0  ;;  %400 = vmatprep.mubr.bf16.mxu1 %v2510_v0  ;;  %v2104_v2 = vld [vmem:[#allocation7 + $0xc] ss:$16 sps:$4 sm:$0xff]   ;;  %v2106_v3 = vld [vmem:[#allocation7] ss:$16 sps:$4 sm:$0xff]   ;;  %v2107_v4 = vld [vmem:[#allocation7 + $0x8] ss:$16 sps:$4 sm:$0xff]  }
  0x70   :  { %327 = vmatprep.subr.bf16.mxu0 %v2102_v1  ;;  %368 = vmatprep.subr.bf16.mxu1 %v2104_v2  ;;  %v2108_v5 = vld [vmem:[#allocation7 + $0x24] ss:$16 sps:$4 sm:$0xff]   ;;  %v2110_v6 = vld [vmem:[#allocation7 + $0x2c] ss:$16 sps:$4 sm:$0xff]   ;;  %v2112_v7 = vld [vmem:[#allocation7 + $0x20] ss:$16 sps:$4 sm:$0xff]  }
  0x71   :  { %328 = vmatpush1.bf16.msra.mxu0 %v2106_v3  ;;  %369 = vmatpush1.bf16.msra.mxu1 %v2107_v4  ;;  %v2113_v8 = vld [vmem:[#allocation7 + $0x28] ss:$16 sps:$4 sm:$0xff]   ;;  %v2114_v9 = vld [vmem:[#allocation7 + $0x44] ss:$16 sps:$4 sm:$0xff]   ;;  %v2116_v10 = vld [vmem:[#allocation7 + $0x4c] ss:$16 sps:$4 sm:$0xff]  }
  0x72   :  { %329 = vmatprep.subr.bf16.mxu0 %v2108_v5  ;;  %370 = vmatprep.subr.bf16.mxu1 %v2110_v6  ;;  %v2118_v11 = vld [vmem:[#allocation7 + $0x40] ss:$16 sps:$4 sm:$0xff]   ;;  %v2119_v12 = vld [vmem:[#allocation7 + $0x48] ss:$16 sps:$4 sm:$0xff]   ;;  %v2120_v13 = vld [vmem:[#allocation7 + $0x64] ss:$16 sps:$4 sm:$0xff]  }
  0x73   :  { %v2122_v14 = vld [vmem:[#allocation7 + $0x6c] ss:$16 sps:$4 sm:$0xff]   ;;  %v2124_v15 = vld [vmem:[#allocation7 + $0x60] ss:$16 sps:$4 sm:$0xff]   ;;  %v2125_v16 = vld [vmem:[#allocation7 + $0x68] ss:$16 sps:$4 sm:$0xff]  }
  0x74   :  { %v2126_v17 = vld [vmem:[#allocation7 + $0x84] ss:$16 sps:$4 sm:$0xff]   ;;  %v2128_v18 = vld [vmem:[#allocation7 + $0x8c] ss:$16 sps:$4 sm:$0xff]   ;;  %v2130_v19 = vld [vmem:[#allocation7 + $0x80] ss:$16 sps:$4 sm:$0xff]  }
  0x75   :  { %330 = vmatpush1.bf16.msra.mxu0 %v2112_v7  ;;  %371 = vmatpush1.bf16.msra.mxu1 %v2113_v8  ;;  %v2131_v20 = vld [vmem:[#allocation7 + $0x88] ss:$16 sps:$4 sm:$0xff]   ;;  %v2132_v21 = vld [vmem:[#allocation7 + $0xa4] ss:$16 sps:$4 sm:$0xff]   ;;  %v2134_v22 = vld [vmem:[#allocation7 + $0xac] ss:$16 sps:$4 sm:$0xff]  }
  0x76   :  { %331 = vmatprep.subr.bf16.mxu0 %v2114_v9  ;;  %372 = vmatprep.subr.bf16.mxu1 %v2116_v10  ;;  %v2136_v23 = vld [vmem:[#allocation7 + $0xa0] ss:$16 sps:$4 sm:$0xff]   ;;  %v2137_v24 = vld [vmem:[#allocation7 + $0xa8] ss:$16 sps:$4 sm:$0xff]   ;;  %v2138_v25 = vld [vmem:[#allocation7 + $0xc4] ss:$16 sps:$4 sm:$0xff]  }
  0x77   :  { %v2140_v26 = vld [vmem:[#allocation7 + $0xcc] ss:$16 sps:$4 sm:$0xff]   ;;  %v2142_v27 = vld [vmem:[#allocation7 + $0xc0] ss:$16 sps:$4 sm:$0xff]   ;;  %v2143_v28 = vld [vmem:[#allocation7 + $0xc8] ss:$16 sps:$4 sm:$0xff]  }
  0x78   :  { %v2144_v29 = vld [vmem:[#allocation7 + $0xe4] ss:$16 sps:$4 sm:$0xff]   ;;  %v2146_v30 = vld [vmem:[#allocation7 + $0xec] ss:$16 sps:$4 sm:$0xff]   ;;  %v2148_v31 = vld [vmem:[#allocation7 + $0xe0] ss:$16 sps:$4 sm:$0xff]  }
  0x79   :  { %332 = vmatpush1.bf16.msra.mxu0 %v2118_v11  ;;  %373 = vmatpush1.bf16.msra.mxu1 %v2119_v12  ;;  %v2149_v32 = vld [vmem:[#allocation7 + $0xe8] ss:$16 sps:$4 sm:$0xff]   ;;  %v2152_v33 = vld [vmem:[#allocation10 + $0x4] ss:$12 sps:$4 sm:$0xff]   ;;  %v2150_v35 = vld [vmem:[#allocation10] ss:$12 sps:$4 sm:$0xff]  }
  0x7a   :  { %333 = vmatprep.subr.bf16.mxu0 %v2120_v13  ;;  %374 = vmatprep.subr.bf16.mxu1 %v2122_v14  ;;  %v112_v34 = vld [vmem:[#allocation2] sm:$0xf]  ;;  %v2153_v36 = vld [vmem:[#allocation10 + $0x8] ss:$12 sps:$4 sm:$0xff]   ;;  %v2157_v40 = vld [vmem:[#allocation10 + $0x20] ss:$12 sps:$4 sm:$0xff]  }
  0x7b   :  { %v2156_v38 = vld [vmem:[#allocation10 + $0x1c] ss:$12 sps:$4 sm:$0xff]   ;;  %v2154_v39 = vld [vmem:[#allocation10 + $0x18] ss:$12 sps:$4 sm:$0xff]   ;;  %v2160_v41 = vld [vmem:[#allocation10 + $0x34] ss:$12 sps:$4 sm:$0xff]  }
  0x7c   :  { %vm2512_vm0 = vmmov 0   ;;  %v2158_v42 = vld [vmem:[#allocation10 + $0x30] ss:$12 sps:$4 sm:$0xff]   ;;  %v2161_v43 = vld [vmem:[#allocation10 + $0x38] ss:$12 sps:$4 sm:$0xff]   ;;  %s2513_s22 = smov [#allocation13]  }
  0x7d   :  { %334 = vmatpush1.bf16.msra.mxu0 %v2124_v15  ;;  %375 = vmatpush1.bf16.msra.mxu1 %v2125_v16  ;;  %v2164_v44 = vld [vmem:[#allocation10 + $0x4c] ss:$12 sps:$4 sm:$0xff]   ;;  %v2162_v45 = vld [vmem:[#allocation10 + $0x48] ss:$12 sps:$4 sm:$0xff]   ;;  %v2165_v46 = vld [vmem:[#allocation10 + $0x50] ss:$12 sps:$4 sm:$0xff]  }
  0x7e   :  { %335 = vmatprep.subr.bf16.mxu0 %v2126_v17  ;;  %376 = vmatprep.subr.bf16.mxu1 %v2128_v18  ;;  %v2168_v47 = vld [vmem:[#allocation10 + $0x64] ss:$12 sps:$4 sm:$0xff]   ;;  %v2166_v48 = vld [vmem:[#allocation10 + $0x60] ss:$12 sps:$4 sm:$0xff]   ;;  %v2169_v49 = vld [vmem:[#allocation10 + $0x68] ss:$12 sps:$4 sm:$0xff]  }
  0x7f   :  { %v2172_v50 = vld [vmem:[#allocation10 + $0x7c] ss:$12 sps:$4 sm:$0xff]   ;;  %v2170_v51 = vld [vmem:[#allocation10 + $0x78] ss:$12 sps:$4 sm:$0xff]   ;;  %v2173_v52 = vld [vmem:[#allocation10 + $0x80] ss:$12 sps:$4 sm:$0xff]  }
  0x80   :  { %v2176_v53 = vld [vmem:[#allocation10 + $0x94] ss:$12 sps:$4 sm:$0xff]   ;;  %v2174_v54 = vld [vmem:[#allocation10 + $0x90] ss:$12 sps:$4 sm:$0xff]   ;;  %v2177_v55 = vld [vmem:[#allocation10 + $0x98] ss:$12 sps:$4 sm:$0xff]  }
  0x81   :  { %336 = vmatpush1.bf16.msra.mxu0 %v2130_v19  ;;  %377 = vmatpush1.bf16.msra.mxu1 %v2131_v20  ;;  %v2180_v56 = vld [vmem:[#allocation10 + $0xac] ss:$12 sps:$4 sm:$0xff]   ;;  %v2178_v57 = vld [vmem:[#allocation10 + $0xa8] ss:$12 sps:$4 sm:$0xff]   ;;  %v2181_v58 = vld [vmem:[#allocation10 + $0xb0] ss:$12 sps:$4 sm:$0xff]  }
  0x82   :  { %337 = vmatprep.subr.bf16.mxu0 %v2132_v21  ;;  %378 = vmatprep.subr.bf16.mxu1 %v2134_v22  ;;  %v2184_v59 = vld [vmem:[#allocation8 + $0x4] ss:$12 sps:$4 sm:$0xff]   ;;  %v545_v61 = vld [vmem:[#allocation5] sm:$0xf]  ;;  %v2182_v62 = vld [vmem:[#allocation8] ss:$12 sps:$4 sm:$0xff]  }
  0x83   :  { %v2187_v60 = vld [vmem:[#allocation8 + $0x184] ss:$12 sps:$4 sm:$0xff]   ;;  %v2185_v63 = vld [vmem:[#allocation8 + $0x180] ss:$12 sps:$4 sm:$0xff]   ;;  %v2193_v1 = vld [vmem:[#allocation8 + $0x19c] ss:$12 sps:$4 sm:$0xff]  }
  0x84   :  { %v2188_v2 = vld [vmem:[#allocation8 + $0x18] ss:$12 sps:$4 sm:$0xff]   ;;  %v2196_v4 = vld [vmem:[#allocation8 + $0x34] ss:$12 sps:$4 sm:$0xff]   ;;  %v2194_v6 = vld [vmem:[#allocation8 + $0x30] ss:$12 sps:$4 sm:$0xff]  }
  0x85   :  { %338 = vmatpush1.bf16.msra.mxu0 %v2136_v23  ;;  %379 = vmatpush1.bf16.msra.mxu1 %v2137_v24  ;;  %v2191_v3 = vld [vmem:[#allocation8 + $0x198] ss:$12 sps:$4 sm:$0xff]   ;;  %v2199_v5 = vld [vmem:[#allocation8 + $0x1b4] ss:$12 sps:$4 sm:$0xff]   ;;  %v2197_v7 = vld [vmem:[#allocation8 + $0x1b0] ss:$12 sps:$4 sm:$0xff]  }
  0x86   :  { %339 = vmatprep.subr.bf16.mxu0 %v2138_v25  ;;  %380 = vmatprep.subr.bf16.mxu1 %v2140_v26  ;;  %v2202_v8 = vld [vmem:[#allocation8 + $0x4c] ss:$12 sps:$4 sm:$0xff]   ;;  %v2200_v10 = vld [vmem:[#allocation8 + $0x48] ss:$12 sps:$4 sm:$0xff]   ;;  %v2208_v12 = vld [vmem:[#allocation8 + $0x64] ss:$12 sps:$4 sm:$0xff]  }
  0x87   :  { %v2205_v9 = vld [vmem:[#allocation8 + $0x1cc] ss:$12 sps:$4 sm:$0xff]   ;;  %v2203_v11 = vld [vmem:[#allocation8 + $0x1c8] ss:$12 sps:$4 sm:$0xff]   ;;  %v2211_v13 = vld [vmem:[#allocation8 + $0x1e4] ss:$12 sps:$4 sm:$0xff]  }
  0x88   :  { %v2206_v14 = vld [vmem:[#allocation8 + $0x60] ss:$12 sps:$4 sm:$0xff]   ;;  %v2214_v16 = vld [vmem:[#allocation8 + $0x7c] ss:$12 sps:$4 sm:$0xff]   ;;  %v2212_v18 = vld [vmem:[#allocation8 + $0x78] ss:$12 sps:$4 sm:$0xff]  }
  0x89   :  { %340 = vmatpush1.bf16.msra.mxu0 %v2142_v27  ;;  %381 = vmatpush1.bf16.msra.mxu1 %v2143_v28  ;;  %v2209_v15 = vld [vmem:[#allocation8 + $0x1e0] ss:$12 sps:$4 sm:$0xff]   ;;  %v2217_v17 = vld [vmem:[#allocation8 + $0x1fc] ss:$12 sps:$4 sm:$0xff]   ;;  %v2215_v19 = vld [vmem:[#allocation8 + $0x1f8] ss:$12 sps:$4 sm:$0xff]  }
  0x8a   :  { %341 = vmatprep.subr.bf16.mxu0 %v2144_v29  ;;  %382 = vmatprep.subr.bf16.mxu1 %v2146_v30  ;;  %v2220_v20 = vld [vmem:[#allocation8 + $0x94] ss:$12 sps:$4 sm:$0xff]   ;;  %v2218_v22 = vld [vmem:[#allocation8 + $0x90] ss:$12 sps:$4 sm:$0xff]   ;;  %v2226_v24 = vld [vmem:[#allocation8 + $0xac] ss:$12 sps:$4 sm:$0xff]  }
  0x8b   :  { %v2223_v21 = vld [vmem:[#allocation8 + $0x214] ss:$12 sps:$4 sm:$0xff]   ;;  %v2221_v23 = vld [vmem:[#allocation8 + $0x210] ss:$12 sps:$4 sm:$0xff]   ;;  %v2229_v25 = vld [vmem:[#allocation8 + $0x22c] ss:$12 sps:$4 sm:$0xff]  }
  0x8c   :  { %v2224_v26 = vld [vmem:[#allocation8 + $0xa8] ss:$12 sps:$4 sm:$0xff]   ;;  %v2232_v28 = vld [vmem:[#allocation8 + $0xc4] ss:$12 sps:$4 sm:$0xff]   ;;  %v2230_v30 = vld [vmem:[#allocation8 + $0xc0] ss:$12 sps:$4 sm:$0xff]  }
  0x8d   :  { %342 = vmatpush1.bf16.msra.mxu0 %v2148_v31  ;;  %383 = vmatpush1.bf16.msra.mxu1 %v2149_v32  ;;  %v2227_v27 = vld [vmem:[#allocation8 + $0x228] ss:$12 sps:$4 sm:$0xff]   ;;  %v2235_v29 = vld [vmem:[#allocation8 + $0x244] ss:$12 sps:$4 sm:$0xff]   ;;  %v2233_v31 = vld [vmem:[#allocation8 + $0x240] ss:$12 sps:$4 sm:$0xff]  }
  0x8e   :  { %706 = vmatprep.subr.bf16.mxu0 %v2152_v33  ;;  %2046 = vmatprep.subr.bf16.mxu1 %v2511_v37  ;;  %v2238_v32 = vld [vmem:[#allocation8 + $0xdc] ss:$12 sps:$4 sm:$0xff]   ;;  %s1773_s23 = sshll.u32 %s2513_s22, 4  ;;  %s1774_s23 = int_to_ptr.vmem [resolvable:$true] %s1773_s23 }
  0x8f   :  { %v2241_v33 = vld [vmem:[#allocation8 + $0x25c] ss:$12 sps:$4 sm:$0xff]   ;;  %s2466_s24 = scalar_lea.vmem %s1774_s23, 128  ;;  %p2471_p7 = scmp.lt.s32.totalorder %s1774_s23, %s1774_s23 }
  0x90   :  { %360 = vmatmul.mubr.bf16.vlgmr.msra.gmra.mrb[0].mxu0 %v112_v34  ;;  %401 = vmatmul.mubr.bf16.vlgmr.msra.gmra.mrb[0].mxu1 %v112_v34  ;;  %v2236_v34 = vld [vmem:[#allocation8 + $0xd8] ss:$12 sps:$4 sm:$0xff]   ;;  %p2467_p6 = scmp.ne.s32.totalorder %s1774_s23, %s2466_s24  ;;  %p2472_p8 = scmp.lt.s32.totalorder %s2466_s24, %s2466_s24 }
  0x91   :  { %707 = vmatpush1.bf16.msra.mxu0 %v2150_v35  ;;  %2047 = vmatpush3.bf16.msra.mxu1 %v2153_v36  ;;  %v2239_v35 = vld [vmem:[#allocation8 + $0x258] ss:$12 sps:$4 sm:$0xff]   ;;  %v2244_v36 = vld [vmem:[#allocation8 + $0xf4] ss:$12 sps:$4 sm:$0xff]  }
  0x92   :  { %708 = vmatprep.subr.bf16.mxu0 %v2156_v38  ;;  %2048 = vmatprep.subr.bf16.mxu1 %v2511_v37  ;;  %v2247_v38 = vld [vmem:[#allocation8 + $0x274] ss:$12 sps:$4 sm:$0xff]   ;;  %p2473_p9 = por %p2472_p8, %p2471_p7 }
  0x93   :  { %738 = vmatprep.mubr.bf16.mxu0 %v2510_v0  ;;  %2062 = vmatprep.mubr.msk.bf16.mxu1 %vm2512_vm0, %v2511_v37  ;;  %v2190_v0 = vld [vmem:[#allocation8 + $0x1c] ss:$12 sps:$4 sm:$0xff]  }
  0x94   :  { %p2474_p10 = pnand %p2473_p9, %p2467_p6 }
  0x95   :  { %709 = vmatpush1.bf16.msra.mxu0 %v2154_v39  ;;  %2049 = vmatpush3.bf16.msra.mxu1 %v2157_v40  ;;  %v2242_v39 = vld [vmem:[#allocation8 + $0xf0] ss:$12 sps:$4 sm:$0xff]  }
  0x96   :  { %710 = vmatprep.subr.bf16.mxu0 %v2160_v41  ;;  %2050 = vmatprep.subr.bf16.mxu1 %v2511_v37  ;;  %v2245_v40 = vld [vmem:[#allocation8 + $0x270] ss:$12 sps:$4 sm:$0xff]   ;;  %v2250_v41 = vld [vmem:[#allocation8 + $0x10c] ss:$12 sps:$4 sm:$0xff]  }
  0x99   :  { %711 = vmatpush1.bf16.msra.mxu0 %v2158_v42  ;;  %2051 = vmatpush3.bf16.msra.mxu1 %v2161_v43  ;;  %v2253_v42 = vld [vmem:[#allocation8 + $0x28c] ss:$12 sps:$4 sm:$0xff]   ;;  %v2248_v43 = vld [vmem:[#allocation8 + $0x108] ss:$12 sps:$4 sm:$0xff]  }
  0x9a   :  { %712 = vmatprep.subr.bf16.mxu0 %v2164_v44  ;;  %2052 = vmatprep.subr.bf16.mxu1 %v2511_v37  ;;  %v2251_v44 = vld [vmem:[#allocation8 + $0x288] ss:$12 sps:$4 sm:$0xff]  }
  0x9d   :  { %713 = vmatpush1.bf16.msra.mxu0 %v2162_v45  ;;  %2053 = vmatpush3.bf16.msra.mxu1 %v2165_v46  ;;  %v2256_v45 = vld [vmem:[#allocation8 + $0x124] ss:$12 sps:$4 sm:$0xff]  }
  0x9e   :  { %714 = vmatprep.subr.bf16.mxu0 %v2168_v47  ;;  %2054 = vmatprep.subr.bf16.mxu1 %v2511_v37  ;;  %v2259_v46 = vld [vmem:[#allocation8 + $0x2a4] ss:$12 sps:$4 sm:$0xff]   ;;  %v2254_v47 = vld [vmem:[#allocation8 + $0x120] ss:$12 sps:$4 sm:$0xff]  }
  0xa1   :  { %715 = vmatpush1.bf16.msra.mxu0 %v2166_v48  ;;  %2055 = vmatpush3.bf16.msra.mxu1 %v2169_v49  ;;  %v2257_v48 = vld [vmem:[#allocation8 + $0x2a0] ss:$12 sps:$4 sm:$0xff]   ;;  %v2262_v49 = vld [vmem:[#allocation8 + $0x13c] ss:$12 sps:$4 sm:$0xff]  }
  0xa2   :  { %716 = vmatprep.subr.bf16.mxu0 %v2172_v50  ;;  %2056 = vmatprep.subr.bf16.mxu1 %v2511_v37  ;;  %v2265_v50 = vld [vmem:[#allocation8 + $0x2bc] ss:$12 sps:$4 sm:$0xff]  }
  0xa5   :  { %717 = vmatpush1.bf16.msra.mxu0 %v2170_v51  ;;  %2057 = vmatpush3.bf16.msra.mxu1 %v2173_v52  ;;  %v2260_v51 = vld [vmem:[#allocation8 + $0x138] ss:$12 sps:$4 sm:$0xff]  }
  0xa6   :  { %718 = vmatprep.subr.bf16.mxu0 %v2176_v53  ;;  %2058 = vmatprep.subr.bf16.mxu1 %v2511_v37  ;;  %v2263_v52 = vld [vmem:[#allocation8 + $0x2b8] ss:$12 sps:$4 sm:$0xff]   ;;  %v2268_v53 = vld [vmem:[#allocation8 + $0x154] ss:$12 sps:$4 sm:$0xff]  }
  0xa9   :  { %719 = vmatpush1.bf16.msra.mxu0 %v2174_v54  ;;  %2059 = vmatpush3.bf16.msra.mxu1 %v2177_v55  ;;  %v2271_v54 = vld [vmem:[#allocation8 + $0x2d4] ss:$12 sps:$4 sm:$0xff]   ;;  %v2266_v55 = vld [vmem:[#allocation8 + $0x150] ss:$12 sps:$4 sm:$0xff]  }
  0xaa   :  { %720 = vmatprep.subr.bf16.mxu0 %v2180_v56  ;;  %2060 = vmatprep.subr.bf16.mxu1 %v2511_v37  ;;  %v2269_v56 = vld [vmem:[#allocation8 + $0x2d0] ss:$12 sps:$4 sm:$0xff]  }
  0xad   :  { %721 = vmatpush1.bf16.msra.mxu0 %v2178_v57  ;;  %2061 = vmatpush3.bf16.msra.mxu1 %v2181_v58  ;;  %v2274_v57 = vld [vmem:[#allocation8 + $0x16c] ss:$12 sps:$4 sm:$0xff]  }
  0xae   :  { %1299 = vmatprep.subr.bf16.mxu0 %v2184_v59  ;;  %1340 = vmatprep.subr.bf16.mxu1 %v2187_v60  ;;  %v2277_v58 = vld [vmem:[#allocation8 + $0x2ec] ss:$12 sps:$4 sm:$0xff]   ;;  %v2272_v59 = vld [vmem:[#allocation8 + $0x168] ss:$12 sps:$4 sm:$0xff]  }
  0xaf   :  { %v2275_v60 = vld [vmem:[#allocation8 + $0x2e8] ss:$12 sps:$4 sm:$0xff]  }
  0xb0   :  { %739 = vmatmul.mubr.bf16.vlgmr.msra.gmra.mrb[4].mxu0 %v545_v61  ;;  %2063 = vmatmul.mubr.bf16.vlgmr.msra.gmra.mrb[4].mxu1 %v545_v61  ;;  %v2278_v61 = vld [vmem:[#allocation8 + $0xc8] ss:$12 sps:$4 sm:$0xff]  }
  0xb1   :  { %1300 = vmatpush1.bf16.msra.mxu0 %v2182_v62  ;;  %1341 = vmatpush1.bf16.msra.mxu1 %v2185_v63  ;;  %v2279_v62 = vld [vmem:[#allocation8 + $0x248] ss:$12 sps:$4 sm:$0xff]   ;;  %v147_v63 = vlaneseq }
  0xb2   :  { %1301 = vmatprep.subr.bf16.mxu0 %v2190_v0  ;;  %1342 = vmatprep.subr.bf16.mxu1 %v2193_v1 }
  0xb3   :  { %v2676_v0 = vshrl.u32 %v147_v63, 7  ;;  %v2308_v63 = vld [vmem:[#allocation8 + $0xb0] ss:$12 sps:$4 sm:$0xff]  }
  0xb5   :  { %1302 = vmatpush1.bf16.msra.mxu0 %v2188_v2  ;;  %1343 = vmatpush1.bf16.msra.mxu1 %v2191_v3  ;;  %v149_v1 = vsub.s32 0, %v2676_v0  ;;  %v157_v2 = vsub.s32 2, %v2676_v0  ;;  %v145_v3 = vld [vmem:[%s2745_s3] sm:$0xf] }
  0xb6   :  { %1303 = vmatprep.subr.bf16.mxu0 %v2196_v4  ;;  %1344 = vmatprep.subr.bf16.mxu1 %v2199_v5  ;;  %v153_v4 = vsub.s32 1, %v2676_v0  ;;  %v161_v5 = vsub.s32 3, %v2676_v0 }
  0xb9   :  { %1304 = vmatpush1.bf16.msra.mxu0 %v2194_v6  ;;  %1345 = vmatpush1.bf16.msra.mxu1 %v2197_v7  ;;  %v150_v6 = vrot.slane %v145_v3, %v149_v1  ;;  %v158_v7 = vrot.slane %v145_v3, %v157_v2 }
  0xba   :  { %1305 = vmatprep.subr.bf16.mxu0 %v2202_v8  ;;  %1346 = vmatprep.subr.bf16.mxu1 %v2205_v9  ;;  %v154_v8 = vrot.slane %v145_v3, %v153_v4  ;;  %v162_v9 = vrot.slane %v145_v3, %v161_v5  ;;  %v2309_v3 = vld [vmem:[#allocation8 + $0x230] ss:$12 sps:$4 sm:$0xff]  }
  0xbd   :  { %1306 = vmatpush1.bf16.msra.mxu0 %v2200_v10  ;;  %1347 = vmatpush1.bf16.msra.mxu1 %v2203_v11 }
  0xbe   :  { %1307 = vmatprep.subr.bf16.mxu0 %v2208_v12  ;;  %1348 = vmatprep.subr.bf16.mxu1 %v2211_v13 }
  0xc1   :  { %1308 = vmatpush1.bf16.msra.mxu0 %v2206_v14  ;;  %1349 = vmatpush1.bf16.msra.mxu1 %v2209_v15 }
  0xc2   :  { %1309 = vmatprep.subr.bf16.mxu0 %v2214_v16  ;;  %1350 = vmatprep.subr.bf16.mxu1 %v2217_v17 }
  0xc5   :  { %1310 = vmatpush1.bf16.msra.mxu0 %v2212_v18  ;;  %1351 = vmatpush1.bf16.msra.mxu1 %v2215_v19 }
  0xc6   :  { %1311 = vmatprep.subr.bf16.mxu0 %v2220_v20  ;;  %1352 = vmatprep.subr.bf16.mxu1 %v2223_v21 }
  0xc9   :  { %1312 = vmatpush1.bf16.msra.mxu0 %v2218_v22  ;;  %1353 = vmatpush1.bf16.msra.mxu1 %v2221_v23 }
  0xca   :  { %1313 = vmatprep.subr.bf16.mxu0 %v2226_v24  ;;  %1354 = vmatprep.subr.bf16.mxu1 %v2229_v25 }
  0xcd   :  { %1314 = vmatpush1.bf16.msra.mxu0 %v2224_v26  ;;  %1355 = vmatpush1.bf16.msra.mxu1 %v2227_v27 }
  0xce   :  { %1315 = vmatprep.subr.bf16.mxu0 %v2232_v28  ;;  %1356 = vmatprep.subr.bf16.mxu1 %v2235_v29  ;;  %v2280_v29 = vld [vmem:[#allocation8 + $0x8] ss:$12 sps:$4 sm:$0xff]  }
  0xd1   :  { %1316 = vmatpush1.bf16.msra.mxu0 %v2230_v30  ;;  %1357 = vmatpush1.bf16.msra.mxu1 %v2233_v31  ;;  %v2281_v30 = vld [vmem:[#allocation8 + $0x188] ss:$12 sps:$4 sm:$0xff]  }
  0xd2   :  { %1317 = vmatprep.subr.bf16.mxu0 %v2238_v32  ;;  %1358 = vmatprep.subr.bf16.mxu1 %v2241_v33  ;;  %v2282_v32 = vld [vmem:[#allocation8 + $0xe0] ss:$12 sps:$4 sm:$0xff]  }
  0xd3   :  { %v2283_v33 = vld [vmem:[#allocation8 + $0x260] ss:$12 sps:$4 sm:$0xff]  }
  0xd5   :  { %1318 = vmatpush1.bf16.msra.mxu0 %v2236_v34  ;;  %1359 = vmatpush1.bf16.msra.mxu1 %v2239_v35  ;;  %v2284_v34 = vld [vmem:[#allocation8 + $0x20] ss:$12 sps:$4 sm:$0xff]  }
  0xd6   :  { %1319 = vmatprep.subr.bf16.mxu0 %v2244_v36  ;;  %1360 = vmatprep.subr.bf16.mxu1 %v2247_v38  ;;  %v2285_v35 = vld [vmem:[#allocation8 + $0x1a0] ss:$12 sps:$4 sm:$0xff]   ;;  %v2286_v36 = vld [vmem:[#allocation8 + $0xf8] ss:$12 sps:$4 sm:$0xff]  }
  0xd7   :  { %v2287_v38 = vld [vmem:[#allocation8 + $0x278] ss:$12 sps:$4 sm:$0xff]  }
  0xd9   :  { %1320 = vmatpush1.bf16.msra.mxu0 %v2242_v39  ;;  %1361 = vmatpush1.bf16.msra.mxu1 %v2245_v40  ;;  %v2288_v39 = vld [vmem:[#allocation8 + $0x38] ss:$12 sps:$4 sm:$0xff]  }
  0xda   :  { %1321 = vmatprep.subr.bf16.mxu0 %v2250_v41  ;;  %1362 = vmatprep.subr.bf16.mxu1 %v2253_v42  ;;  %v2289_v40 = vld [vmem:[#allocation8 + $0x1b8] ss:$12 sps:$4 sm:$0xff]   ;;  %v2290_v41 = vld [vmem:[#allocation8 + $0x110] ss:$12 sps:$4 sm:$0xff]  }
  0xdb   :  { %v2291_v42 = vld [vmem:[#allocation8 + $0x290] ss:$12 sps:$4 sm:$0xff]  }
  0xdd   :  { %1322 = vmatpush1.bf16.msra.mxu0 %v2248_v43  ;;  %1363 = vmatpush1.bf16.msra.mxu1 %v2251_v44  ;;  %v2292_v43 = vld [vmem:[#allocation8 + $0x50] ss:$12 sps:$4 sm:$0xff]  }
  0xde   :  { %1323 = vmatprep.subr.bf16.mxu0 %v2256_v45  ;;  %1364 = vmatprep.subr.bf16.mxu1 %v2259_v46  ;;  %v2293_v44 = vld [vmem:[#allocation8 + $0x1d0] ss:$12 sps:$4 sm:$0xff]   ;;  %v2294_v45 = vld [vmem:[#allocation8 + $0x128] ss:$12 sps:$4 sm:$0xff]  }
  0xdf   :  { %v2295_v46 = vld [vmem:[#allocation8 + $0x2a8] ss:$12 sps:$4 sm:$0xff]  }
  0xe1   :  { %1324 = vmatpush1.bf16.msra.mxu0 %v2254_v47  ;;  %1365 = vmatpush1.bf16.msra.mxu1 %v2257_v48  ;;  %v2296_v47 = vld [vmem:[#allocation8 + $0x68] ss:$12 sps:$4 sm:$0xff]  }
  0xe2   :  { %1325 = vmatprep.subr.bf16.mxu0 %v2262_v49  ;;  %1366 = vmatprep.subr.bf16.mxu1 %v2265_v50  ;;  %v2297_v48 = vld [vmem:[#allocation8 + $0x1e8] ss:$12 sps:$4 sm:$0xff]   ;;  %v2298_v49 = vld [vmem:[#allocation8 + $0x140] ss:$12 sps:$4 sm:$0xff]  }
  0xe3   :  { %v2299_v50 = vld [vmem:[#allocation8 + $0x2c0] ss:$12 sps:$4 sm:$0xff]  }
  0xe5   :  { %1326 = vmatpush1.bf16.msra.mxu0 %v2260_v51  ;;  %1367 = vmatpush1.bf16.msra.mxu1 %v2263_v52  ;;  %v2300_v51 = vld [vmem:[#allocation8 + $0x80] ss:$12 sps:$4 sm:$0xff]  }
  0xe6   :  { %1327 = vmatprep.subr.bf16.mxu0 %v2268_v53  ;;  %1368 = vmatprep.subr.bf16.mxu1 %v2271_v54  ;;  %v2301_v52 = vld [vmem:[#allocation8 + $0x200] ss:$12 sps:$4 sm:$0xff]   ;;  %v2302_v53 = vld [vmem:[#allocation8 + $0x158] ss:$12 sps:$4 sm:$0xff]  }
  0xe7   :  { %v2303_v54 = vld [vmem:[#allocation8 + $0x2d8] ss:$12 sps:$4 sm:$0xff]  }
  0xe9   :  { %1328 = vmatpush1.bf16.msra.mxu0 %v2266_v55  ;;  %1369 = vmatpush1.bf16.msra.mxu1 %v2269_v56  ;;  %v2304_v55 = vld [vmem:[#allocation8 + $0x98] ss:$12 sps:$4 sm:$0xff]  }
  0xea   :  { %1329 = vmatprep.subr.bf16.mxu0 %v2274_v57  ;;  %1370 = vmatprep.subr.bf16.mxu1 %v2277_v58  ;;  %v2305_v56 = vld [vmem:[#allocation8 + $0x218] ss:$12 sps:$4 sm:$0xff]   ;;  %v2306_v57 = vld [vmem:[#allocation8 + $0x170] ss:$12 sps:$4 sm:$0xff]  }
  0xeb   :  { %v2307_v58 = vld [vmem:[#allocation8 + $0x2f0] ss:$12 sps:$4 sm:$0xff]  }
  0xed   :  { %1330 = vmatpush1.bf16.msra.mxu0 %v2272_v59  ;;  %1371 = vmatpush1.bf16.msra.mxu1 %v2275_v60 }
  0xee   :  { %1971 = vmatprep.subr.bf16.mxu0 %v2278_v61  ;;  %1993 = vmatprep.subr.bf16.mxu1 %v2279_v62 }
 0x163   :  { %v361_v10 = vpop.f32.mrb[0].mxu0  ;;  %v402_v11 = vpop.f32.mrb[0].mxu1 }
 0x164   :  { %v362_v12 = vadd.f32 %v361_v10, %v150_v6  ;;  %v403_v13 = vadd.f32 %v402_v11, %v158_v7  ;;  %v363_v14 = vpop.f32.mrb[1].mxu0  ;;  %v404_v15 = vpop.f32.mrb[1].mxu1  ;;  %v2311_v10 = vld [vmem:[#allocation11] sm:$0xff]   ;;  %v2312_v11 = vld [vmem:[#allocation11 + $0x48] sm:$0xff]  }
 0x165   :  { %v364_v16 = vadd.f32 %v363_v14, %v154_v8  ;;  %v405_v17 = vadd.f32 %v404_v15, %v162_v9  ;;  %v365_v18 = vpop.f32.mrb[2].mxu0  ;;  %v406_v19 = vpop.f32.mrb[2].mxu1  ;;  %v2310_v9 = vld [vmem:[#allocation11 + $0x40] sm:$0xff]   ;;  %v2315_v14 = vld [vmem:[#allocation11 + $0x10] sm:$0xff]   ;;  %v2316_v15 = vld [vmem:[#allocation11 + $0x58] sm:$0xff]  }
 0x166   :  { %v409_v20 = vmax.f32 %v362_v12, 0.0  ;;  %v411_v21 = vmax.f32 %v403_v13, 0.0  ;;  %v366_v22 = vpop.f32.mrb[3].mxu0  ;;  %v407_v23 = vpop.f32.mrb[3].mxu1  ;;  %v2313_v12 = vld [vmem:[#allocation11 + $0x8] sm:$0xff]   ;;  %v2314_v13 = vld [vmem:[#allocation11 + $0x50] sm:$0xff]  }
 0x167   :  { %v410_v24 = vmax.f32 %v364_v16, 0.0  ;;  %v412_v25 = vmax.f32 %v405_v17, 0.0  ;;  %v2317_v16 = vld [vmem:[#allocation11 + $0x18] sm:$0xff]   ;;  %v2318_v17 = vld [vmem:[#allocation11 + $0x60] sm:$0xff]   ;;  %v2320_v19 = vld [vmem:[#allocation11 + $0x68] sm:$0xff]  }
 0x168   :  { %v2691_v26 = vpack.c.bf16 %v411_v21, %v411_v21  ;;  %v2693_v31 = vpack.c.bf16 %v409_v20, %v409_v20  ;;  %v2319_v18 = vld [vmem:[#allocation11 + $0x20] sm:$0xff]   ;;  %v2321_v20 = vld [vmem:[#allocation11 + $0x28] sm:$0xff]   ;;  %v2322_v21 = vld [vmem:[#allocation11 + $0x70] sm:$0xff]  }
 0x169   :  { %v414_v27 = vpack.c.bf16 %v410_v24, %v410_v24  ;;  %v416_v28 = vpack.c.bf16 %v412_v25, %v412_v25  ;;  %v2323_v22 = vld [vmem:[#allocation11 + $0x30] sm:$0xff]   ;;  %v2324_v23 = vld [vmem:[#allocation11 + $0x78] sm:$0xff]   ;;  %v2326_v25 = vld [vmem:[#allocation11 + $0x80] sm:$0xff]  }
 0x16a   :  { %v2325_v24 = vld [vmem:[#allocation11 + $0x38] sm:$0xff]  }
 0x16b   :  { %1331 = vmatprep.mubr.bf16.mxu0 %v414_v27  ;;  %1372 = vmatprep.mubr.bf16.mxu1 %v416_v28 }
 0x16c   :  { %1332 = vmatmul.mubr.bf16.vlgmr.msra.gmra.mrb[8].mxu0 %v2693_v31  ;;  %1373 = vmatmul.mubr.bf16.vlgmr.msra.gmra.mrb[8].mxu1 %v2691_v26 }
 0x16d   :  { %1972 = vmatpush3.bf16.msra.mxu0 %v2280_v29  ;;  %1994 = vmatpush3.bf16.msra.mxu1 %v2281_v30  ;;  %v2330_v29 = vld [vmem:[#allocation11 + $0xa0] sm:$0xff]   ;;  %v2331_v30 = vld [vmem:[#allocation11 + $0xa8] sm:$0xff]  }
 0x16e   :  { %1413 = vmatprep.mubr.bf16.mxu0 %v414_v27  ;;  %1453 = vmatprep.mubr.bf16.mxu1 %v416_v28  ;;  %v2328_v27 = vld [vmem:[#allocation11 + $0x90] sm:$0xff]   ;;  %v2329_v28 = vld [vmem:[#allocation11 + $0x98] sm:$0xff]  }
 0x16f   :  { %1973 = vmatprep.subr.bf16.mxu0 %v2282_v32  ;;  %1995 = vmatprep.subr.bf16.mxu1 %v2283_v33  ;;  %v2333_v32 = vld [vmem:[#allocation11 + $0xb8] sm:$0xff]  }
 0x170   :  { %v1461_v33 = vld [vmem:[%s2748_s6] sm:$0x7] }
 0x171   :  { %1974 = vmatpush3.bf16.msra.mxu0 %v2284_v34  ;;  %1996 = vmatpush3.bf16.msra.mxu1 %v2285_v35 }
 0x172   :  { %1975 = vmatprep.subr.bf16.mxu0 %v2286_v36  ;;  %1997 = vmatprep.subr.bf16.mxu1 %v2287_v38  ;;  %v1466_v38 = vrot.slane %v1461_v33, %v149_v1 }
 0x175   :  { %1976 = vmatpush3.bf16.msra.mxu0 %v2288_v39  ;;  %1998 = vmatpush3.bf16.msra.mxu1 %v2289_v40 }
 0x176   :  { %1977 = vmatprep.subr.bf16.mxu0 %v2290_v41  ;;  %1999 = vmatprep.subr.bf16.mxu1 %v2291_v42 }
 0x179   :  { %1978 = vmatpush3.bf16.msra.mxu0 %v2292_v43  ;;  %2000 = vmatpush3.bf16.msra.mxu1 %v2293_v44 }
 0x17a   :  { %1979 = vmatprep.subr.bf16.mxu0 %v2294_v45  ;;  %2001 = vmatprep.subr.bf16.mxu1 %v2295_v46 }
 0x17d   :  { %1980 = vmatpush3.bf16.msra.mxu0 %v2296_v47  ;;  %2002 = vmatpush3.bf16.msra.mxu1 %v2297_v48 }
 0x17e   :  { %1981 = vmatprep.subr.bf16.mxu0 %v2298_v49  ;;  %2003 = vmatprep.subr.bf16.mxu1 %v2299_v50 }
 0x181   :  { %1982 = vmatpush3.bf16.msra.mxu0 %v2300_v51  ;;  %2004 = vmatpush3.bf16.msra.mxu1 %v2301_v52 }
 0x182   :  { %1983 = vmatprep.subr.bf16.mxu0 %v2302_v53  ;;  %2005 = vmatprep.subr.bf16.mxu1 %v2303_v54 }
 0x183   :  { %v2697_v59 = vpop.f32.mrb[4].mxu0  ;;  %v2699_v60 = vpop.f32.mrb[4].mxu1 }
 0x184   :  { %v2701_v61 = vpop.f32.mrb[5].mxu0  ;;  %v2064_v62 = vpop.f32.mrb[5].mxu1 }
 0x185   :  { %1984 = vmatpush3.bf16.msra.mxu0 %v2304_v55  ;;  %2006 = vmatpush3.bf16.msra.mxu1 %v2305_v56  ;;  %v744_v5 = vpop.f32.mrb[6].mxu0  ;;  %v784_v6 = vpop.f32.mrb[6].mxu1 }
 0x186   :  { %1985 = vmatprep.subr.bf16.mxu0 %v2306_v57  ;;  %2007 = vmatprep.subr.bf16.mxu1 %v2307_v58  ;;  %v745_v7 = vpop.f32.mrb[7].mxu0  ;;  %v2065_v8 = vpop.f32.mrb[7].mxu1 }
 0x189   :  { %1986 = vmatpush3.bf16.msra.mxu0 %v2308_v63  ;;  %2008 = vmatpush3.bf16.msra.mxu1 %v2309_v3  ;;  %v1474_v3 = vrot.slane %v1461_v33, %v157_v2 }
 0x18a   :  { %2015 = vmatprep.subr.bf16.mxu0 %v2310_v9  ;;  %2066 = vmatprep.subr.bf16.mxu1 %v2511_v37 }
 0x18c   :  { %1414 = vmatmul.mubr.bf16.vlgmr.msra.gmra.mrb[12].mxu0 %v2693_v31  ;;  %1454 = vmatmul.mubr.bf16.vlgmr.msra.gmra.mrb[12].mxu1 %v2691_v26  ;;  %v2327_v26 = vld [vmem:[#allocation11 + $0x88] sm:$0xff]   ;;  %v2332_v31 = vld [vmem:[#allocation11 + $0xb0] sm:$0xff]  }
 0x18d   :  { %2016 = vmatpush3.bf16.msra.mxu0 %v2311_v10  ;;  %2082 = vmatprep.mubr.msk.bf16.mxu1 %vm2512_vm0, %v2511_v37 }
 0x18e   :  { %2017 = vmatprep.subr.bf16.mxu0 %v2312_v11  ;;  %2067 = vmatpush3.bf16.msra.mxu1 %v2326_v25 }
 0x18f   :  { %2068 = vmatprep.subr.bf16.mxu1 %v2511_v37 }
 0x191   :  { %2018 = vmatpush3.bf16.msra.mxu0 %v2313_v12 }
 0x192   :  { %2019 = vmatprep.subr.bf16.mxu0 %v2314_v13  ;;  %2069 = vmatpush3.bf16.msra.mxu1 %v2327_v26 }
 0x193   :  { %2070 = vmatprep.subr.bf16.mxu1 %v2511_v37 }
 0x195   :  { %2020 = vmatpush3.bf16.msra.mxu0 %v2315_v14  ;;  %v1937_v14 = vld [vmem:[%s2750_s8] ss:$0 sm:$0xff] }
 0x196   :  { %2021 = vmatprep.subr.bf16.mxu0 %v2316_v15  ;;  %2071 = vmatpush3.bf16.msra.mxu1 %v2328_v27 }
 0x197   :  { %2072 = vmatprep.subr.bf16.mxu1 %v2511_v37 }
 0x199   :  { %2022 = vmatpush3.bf16.msra.mxu0 %v2317_v16 }
 0x19a   :  { %2023 = vmatprep.subr.bf16.mxu0 %v2318_v17  ;;  %2073 = vmatpush3.bf16.msra.mxu1 %v2329_v28 }
 0x19b   :  { %2074 = vmatprep.subr.bf16.mxu1 %v2511_v37 }
 0x19d   :  { %2024 = vmatpush3.bf16.msra.mxu0 %v2319_v18 }
 0x19e   :  { %2025 = vmatprep.subr.bf16.mxu0 %v2320_v19  ;;  %2075 = vmatpush3.bf16.msra.mxu1 %v2330_v29 }
 0x19f   :  { %2076 = vmatprep.subr.bf16.mxu1 %v2511_v37 }
 0x1a1   :  { %2026 = vmatpush3.bf16.msra.mxu0 %v2321_v20 }
 0x1a2   :  { %2027 = vmatprep.subr.bf16.mxu0 %v2322_v21  ;;  %2077 = vmatpush3.bf16.msra.mxu1 %v2331_v30 }
 0x1a3   :  { %2078 = vmatprep.subr.bf16.mxu1 %v2511_v37 }
 0x1a5   :  { %2028 = vmatpush3.bf16.msra.mxu0 %v2323_v22 }
 0x1a6   :  { %2029 = vmatprep.subr.bf16.mxu0 %v2324_v23  ;;  %2079 = vmatpush3.bf16.msra.mxu1 %v2332_v31 }
 0x1a7   :  { %2080 = vmatprep.subr.bf16.mxu1 %v2511_v37  ;;  %v1470_v37 = vrot.slane %v1461_v33, %v153_v4 }
 0x1a9   :  { %2030 = vmatpush3.bf16.msra.mxu0 %v2325_v24 }
 0x1aa   :  { %2081 = vmatpush3.bf16.msra.mxu1 %v2333_v32 }
 0x23f   :  { %v1333_v34 = vpop.f32.mrb[8].mxu0  ;;  %v1374_v35 = vpop.f32.mrb[8].mxu1 }
 0x240   :  { %v1334_v36 = vadd.f32 %v1333_v34, %v2697_v59  ;;  %v1335_v39 = vpop.f32.mrb[9].mxu0  ;;  %v1376_v40 = vpop.f32.mrb[9].mxu1 }
 0x241   :  { %v1336_v41 = vadd.f32 %v1335_v39, %v2701_v61  ;;  %v1337_v42 = vpop.f32.mrb[10].mxu0  ;;  %v1378_v43 = vpop.f32.mrb[10].mxu1 }
 0x242   :  { %v1375_v44 = vadd.f32 %v1374_v35, %v1334_v36  ;;  %v1338_v45 = vpop.f32.mrb[11].mxu0  ;;  %v1379_v46 = vpop.f32.mrb[11].mxu1 }
 0x243   :  { %v1377_v47 = vadd.f32 %v1376_v40, %v1336_v41 }
 0x244   :  { %v1478_v48 = vadd.f32 %v1466_v38, %v1375_v44 }
 0x245   :  { %v1479_v49 = vadd.f32 %v1470_v37, %v1377_v47 }
 0x246   :  { %v1481_v50 = vmax.f32 %v1478_v48, 0.0 }
 0x247   :  { %v1482_v51 = vmax.f32 %v1479_v49, 0.0 }
 0x248   :  { %v1484_v53 = vpack.c.bf16 %v1481_v50, %v1481_v50 }
 0x249   :  { %v1485_v52 = vpack.c.bf16 %v1482_v51, %v1482_v51 }
 0x24b   :  { %1718 = vmatprep.mubr.bf16.mxu0 %v1485_v52 }
 0x24c   :  { %1719 = vmatmul.mubr.bf16.vlgmr.msra.gmra.mrb[16].mxu0 %v1484_v53 }
 0x25f   :  { %v1987_v1 = vpop.f32.mrb[12].mxu0  ;;  %v2009_v54 = vpop.f32.mrb[12].mxu1 }
 0x260   :  { %v1988_v55 = vpop.f32.mrb[13].mxu0  ;;  %v2010_v56 = vpop.f32.mrb[13].mxu1 }
 0x261   :  { %v1989_v57 = vadd.f32 %v1988_v55, %v1987_v1  ;;  %v2011_v4 = vadd.f32 %v2010_v56, %v2009_v54  ;;  %v1990_v58 = vpop.f32.mrb[14].mxu0  ;;  %v2012_v59 = vpop.f32.mrb[14].mxu1 }
 0x262   :  { %v1991_v61 = vpop.f32.mrb[15].mxu0  ;;  %v2013_v62 = vpop.f32.mrb[15].mxu1 }
 0x263   :  { %v1416_v63 = vadd.f32 %v1989_v57, %v2699_v60 }
 0x265   :  { %v1456_v5 = vadd.f32 %v2011_v4, %v1416_v63 }
 0x267   :  { %v1480_v6 = vadd.f32 %v1474_v3, %v1456_v5 }
 0x269   :  { %v1483_v7 = vmax.f32 %v1480_v6, 0.0 }
 0x26b   :  { %v1486_v8 = vpack.c.bf16 %v1483_v7, %v1483_v7 }
 0x26d   :  { %2083 = vmatmul.mubr.bf16.vlgmr.msra.gmra.mrb[16].mxu1 %v1486_v8 }
 0x31f   :  { %v2031_v9 = vpop.f32.mrb[16].mxu0 }
 0x320   :  { %v2032_v10 = vpop.f32.mrb[17].mxu0 }
 0x321   :  { %v2033_v11 = vadd.f32 %v2032_v10, %v2031_v9  ;;  %v2034_v12 = vpop.f32.mrb[18].mxu0 }
 0x322   :  { %v2035_v13 = vpop.f32.mrb[19].mxu0 }
 0x323   :  { %v1721_v60 = vadd.f32 %v2033_v11, %v1937_v14 }
 0x340   :  { %v1760_v15 = vpop.f32.mrb[16].mxu1 }
 0x341   :  { %v1761_v0 = vadd.f32 %v1760_v15, %v1721_v60  ;;  %v2084_v2 = vpop.f32.mrb[17].mxu1 }
 0x342   :  { %v1763_v16 = vpop.f32.mrb[18].mxu1 }
 0x343   :  { %1766 = vst [vmem:[#allocation13] sm:$0xff] %v1761_v0  ;;  %v2085_v17 = vpop.f32.mrb[19].mxu1 }
 0x344   :  { %2477 = shalt.err (!%p2474_p10)
}
 0x345   :  { %s2478_s8 = scalar_lea.hbm %s2751_s9, 128 }
 0x346   :  { %p2479_p11 = scmp.ne.s32.totalorder %s2751_s9, %s2478_s8  ;;  %p2482_p12 = scmp.lt.u32.totalorder %s2478_s8, %s2751_s9 }
 0x348   :  { %p2484_p13 = pnand %p2482_p12, %p2479_p11 }
 0x34a   :  { %2487 = shalt.err (!%p2484_p13)
}
 0x34b   :  { %1776 = dma.vmem_to_hbm [thread:$0]  %s1774_s23, 128, %s2751_s9, [#allocation4]  }
 0x34c   :  { %2496 = dma.done.wait [#allocation4], 128  }
 0x34d   :  { %2497 = vsyncadd [#allocation4], 4294967168 }
 0x34e   :  { %1780 = vsyncpa [#allocation3], 1 }
 0x34f   :  { %1781 = vsyncpa [#allocation6], 1 }
 0x350   :  { %1782 = vsyncpa [#allocation9], 1 }
 0x351   :  { %1783 = vsyncpa [#allocation12], 1 }
 0x352   :  { %1784 = vsyncpa [#allocation4], 1 }

</bundles_post_ra>
